<compile_context>
chip_gen: v7x
topology: tpu7x:2x2x1
jax: 0.10.0
libtpu: 0.0.40
codegen_flags: <defaults>
</compile_context>

<pallas_src>
import jax
import jax.numpy as jnp
from jax.experimental import pallas as pl
from jax.experimental.pallas import tpu as pltpu


def _round_up(x, m):
    return ((x + m - 1) // m) * m


def _fc_act_kernel(x_ref, wt_ref, b_ref, o_ref, acc_ref):
    """acc = bias; acc += x_tile @ wt_tile over K; out = relu(acc)."""
    k = pl.program_id(1)

    @pl.when(k == 0)
    def _init():
        # Fold the bias into the accumulator init (saves a VALU pass later).
        acc_ref[...] = jnp.zeros_like(acc_ref) + b_ref[...]

    acc_ref[...] += jnp.dot(
        x_ref[...], wt_ref[...], preferred_element_type=jnp.float32
    )

    @pl.when(k == pl.num_programs(1) - 1)
    def _finalize():
        # Elementwise bias/ReLU kept in f32 (v5e VPU has no bf16); cast on store.
        o_ref[...] = jnp.maximum(acc_ref[...], 0.0).astype(o_ref.dtype)


def _g_matmul_kernel(g_ref, y_ref, o_ref, acc_ref):
    """acc += G_tile @ y_tile over K; out = acc."""
    k = pl.program_id(1)

    @pl.when(k == 0)
    def _init():
        acc_ref[...] = jnp.zeros_like(acc_ref)

    acc_ref[...] += jnp.dot(
        g_ref[...], y_ref[...], preferred_element_type=jnp.float32
    )

    @pl.when(k == pl.num_programs(1) - 1)
    def _finalize():
        o_ref[...] = acc_ref[...].astype(o_ref.dtype)


def hgnn_conv_forward(feats, G, W, b, *, tile_n=256,
                      vmem_limit_bytes=64 * 1024 * 1024):
    """HGNN_conv forward: G @ relu(feats @ W.T + b). Dropout is identity (eval).

    feats: (N, dim_in) f32, G: (N, N) f32, W: (dim_out, dim_in) f32, b: (dim_out,).
    Returns (N, dim_out) f32.
    """
    N, dim_in = feats.shape
    dim_out = W.shape[0]
    if b is None:
        b = jnp.zeros((dim_out,), jnp.float32)

    # ---- Padded, lane-dense shapes --------------------------------------
    Np = _round_up(N, 8)
    tn = min(tile_n, Np)              # row tile (also the K tile of stage 2)
    Np = _round_up(Np, tn)            # pad N so the grid divides evenly

    Ki = _round_up(dim_in, 128)       # contracting dim of stage 1
    tk = next(t for t in (512, 256, 128) if Ki % t == 0)

    Do = _round_up(dim_out, 128)      # lane-dense output width

    # bf16 MXU operands, zero-padded.  Zero padding does not change the math:
    # padded feature columns hit zero Wt rows, padded y rows hit zero G columns,
    # padded output rows/cols are sliced off at the end.
    feats_p = jnp.zeros((Np, Ki), jnp.bfloat16).at[:N, :dim_in].set(
        feats.astype(jnp.bfloat16))
    wt_p = jnp.zeros((Ki, Do), jnp.bfloat16).at[:dim_in, :dim_out].set(
        W.T.astype(jnp.bfloat16))
    b_p = jnp.zeros((1, Do), jnp.float32).at[0, :dim_out].set(
        b.astype(jnp.float32))
    g_p = jnp.zeros((Np, Np), jnp.bfloat16).at[:N, :N].set(
        G.astype(jnp.bfloat16))

    cparams = pltpu.CompilerParams(
        dimension_semantics=("parallel", "arbitrary"),
        vmem_limit_bytes=vmem_limit_bytes,
    )

    # ---- Stage 1: y = relu(feats @ Wt + b), K-tiled over dim_in ----------
    y = pl.pallas_call(
        _fc_act_kernel,
        out_shape=jax.ShapeDtypeStruct((Np, Do), jnp.bfloat16),
        grid=(Np // tn, Ki // tk),
        in_specs=[
            pl.BlockSpec((tn, tk), lambda i, k: (i, k)),
            pl.BlockSpec((tk, Do), lambda i, k: (k, 0)),
            pl.BlockSpec((1, Do), lambda i, k: (0, 0)),
        ],
        out_specs=pl.BlockSpec((tn, Do), lambda i, k: (i, 0)),
        scratch_shapes=[pltpu.VMEM((tn, Do), jnp.float32)],
        compiler_params=cparams,
        cost_estimate=pl.CostEstimate(
            flops=2 * Np * Ki * Do,
            transcendentals=0,
            bytes_accessed=Np * Ki * 2 + Ki * Do * 2 + Do * 4 + Np * Do * 2,
        ),
    )(feats_p, wt_p, b_p)

    # ---- Stage 2: out = G @ y, K-tiled over N (VMEM-bounded for large N) --
    out = pl.pallas_call(
        _g_matmul_kernel,
        out_shape=jax.ShapeDtypeStruct((Np, Do), jnp.float32),
        grid=(Np // tn, Np // tn),
        in_specs=[
            pl.BlockSpec((tn, tn), lambda i, k: (i, k)),
            pl.BlockSpec((tn, Do), lambda i, k: (k, 0)),
        ],
        out_specs=pl.BlockSpec((tn, Do), lambda i, k: (i, 0)),
        scratch_shapes=[pltpu.VMEM((tn, Do), jnp.float32)],
        compiler_params=cparams,
        cost_estimate=pl.CostEstimate(
            flops=2 * Np * Np * Do,
            transcendentals=0,
            bytes_accessed=Np * Np * 2 + Np * Do * 2 + Np * Do * 4,
        ),
    )(g_p, y)

    # Dropout(p=0.5) is identity in eval mode.
    # TODO(synk): training-mode dropout would use pltpu.prng_seed/prng_random_bits.
    return out[:N, :dim_out]


if __name__ == "__main__":
    N, dim_in, dim_out = 16, 32, 16

    key = jax.random.PRNGKey(0)
    k_feat, k_g, k_w, k_b = jax.random.split(key, 4)

    feats = jax.random.normal(k_feat, (N, dim_in), dtype=jnp.float32)
    G = jax.random.normal(k_g, (N, N), dtype=jnp.float32)

    # Deterministic nn.Linear-style init: U(-1/sqrt(dim_in), 1/sqrt(dim_in)).
    bound = 1.0 / (dim_in ** 0.5)
    W = jax.random.uniform(k_w, (dim_out, dim_in), dtype=jnp.float32,
                           minval=-bound, maxval=bound)
    b = jax.random.uniform(k_b, (dim_out,), dtype=jnp.float32,
                           minval=-bound, maxval=bound)

    out = hgnn_conv_forward(feats, G, W, b)
    out = jax.block_until_ready(out)
    assert out.shape == (N, dim_out)

    # Reference with the same bf16-operand / f32-accumulation recipe.
    y_ref = jnp.maximum(
        jnp.dot(feats.astype(jnp.bfloat16), W.T.astype(jnp.bfloat16),
                preferred_element_type=jnp.float32) + b, 0.0)
    ref = jnp.dot(G.astype(jnp.bfloat16), y_ref.astype(jnp.bfloat16),
                  preferred_element_type=jnp.float32)
    assert jnp.allclose(out, ref, rtol=1e-3, atol=1e-3), \
        float(jnp.max(jnp.abs(out - ref)))

    print("KERNEL_OK")
</pallas_src>

<mosaic_0001>
module attributes {stable_mosaic.version = 11 : i64} {
  func.func @_fc_act_kernel(%arg0: i32, %arg1: i32, %arg2: memref<16x128xbf16, #tpu.memory_space<vmem>>, %arg3: memref<128x128xbf16, #tpu.memory_space<vmem>>, %arg4: memref<1x128xf32, #tpu.memory_space<vmem>>, %arg5: memref<16x128xbf16, #tpu.memory_space<vmem>>, %arg6: memref<16x128xf32, #tpu.memory_space<vmem>>) attributes {dimension_semantics = [#tpu.dimension_semantics<parallel>, #tpu.dimension_semantics<arbitrary>], iteration_bounds = array<i64: 1, 1>, scalar_prefetch = 0 : i64, scratch_operands = 1 : i64, tpu.core_type = #tpu.core_type<tc>, window_params = [{transform_indices = @transform_0, window_bounds = array<i64: 16, 128>}, {transform_indices = @transform_1, window_bounds = array<i64: 128, 128>}, {pipeline_mode = #tpu.pipeline_mode<synchronous>, transform_indices = @transform_2, window_bounds = array<i64: 1, 128>}, {transform_indices = @transform_3, window_bounds = array<i64: 16, 128>}]} {
    %c0_i32 = arith.constant 0 : i32
    %0 = arith.cmpi eq, %arg1, %c0_i32 : i32
    %1 = arith.extui %0 : i1 to i32
    %c0_i32_0 = arith.constant 0 : i32
    %2 = arith.cmpi ne, %1, %c0_i32_0 : i32
    scf.if %2 {
      %cst_10 = arith.constant 0.000000e+00 : f32
      %12 = vector.broadcast %cst_10 : f32 to vector<16x128xf32>
      %c0_11 = arith.constant 0 : index
      %c0_12 = arith.constant 0 : index
      %13 = vector.load %arg4[%c0_11, %c0_12] : memref<1x128xf32, #tpu.memory_space<vmem>>, vector<1x128xf32>
      %14 = vector.broadcast %13 : vector<1x128xf32> to vector<16x128xf32>
      %15 = arith.addf %12, %14 : vector<16x128xf32>
      %c0_13 = arith.constant 0 : index
      %c0_14 = arith.constant 0 : index
      %16 = vector.load %arg6[%c0_13, %c0_14] : memref<16x128xf32, #tpu.memory_space<vmem>>, vector<16x128xf32>
      tpu.vector_store %arg6[%c0_13, %c0_14], %15 {strides = array<i32>} : memref<16x128xf32, #tpu.memory_space<vmem>>, vector<16x128xf32>,
    } else {
    }
    %c0 = arith.constant 0 : index
    %c0_1 = arith.constant 0 : index
    %3 = vector.load %arg6[%c0, %c0_1] : memref<16x128xf32, #tpu.memory_space<vmem>>, vector<16x128xf32>
    %c0_2 = arith.constant 0 : index
    %c0_3 = arith.constant 0 : index
    %4 = vector.load %arg2[%c0_2, %c0_3] : memref<16x128xbf16, #tpu.memory_space<vmem>>, vector<16x128xbf16>
    %c0_4 = arith.constant 0 : index
    %c0_5 = arith.constant 0 : index
    %5 = vector.load %arg3[%c0_4, %c0_5] : memref<128x128xbf16, #tpu.memory_space<vmem>>, vector<128x128xbf16>
    %cst = arith.constant dense<0.000000e+00> : vector<16x128xf32>
    %6 = tpu.matmul %4, %5, %cst {dimension_numbers = #tpu.dot_dimension_numbers<[1], [0], [0], [1], [0, 0, 1, 1], [], []>} : vector<16x128xbf16>, vector<128x128xbf16>, vector<16x128xf32> -> vector<16x128xf32>
    %7 = arith.addf %3, %6 : vector<16x128xf32>
    %c0_6 = arith.constant 0 : index
    %c0_7 = arith.constant 0 : index
    %8 = vector.load %arg6[%c0_6, %c0_7] : memref<16x128xf32, #tpu.memory_space<vmem>>, vector<16x128xf32>
    tpu.vector_store %arg6[%c0_6, %c0_7], %7 {strides = array<i32>} : memref<16x128xf32, #tpu.memory_space<vmem>>, vector<16x128xf32>,
    %c0_i32_8 = arith.constant 0 : i32
    %9 = arith.cmpi eq, %arg1, %c0_i32_8 : i32
    %10 = arith.extui %9 : i1 to i32
    %c0_i32_9 = arith.constant 0 : i32
    %11 = arith.cmpi ne, %10, %c0_i32_9 : i32
    scf.if %11 {
      %c0_10 = arith.constant 0 : index
      %c0_11 = arith.constant 0 : index
      %12 = vector.load %arg6[%c0_10, %c0_11] : memref<16x128xf32, #tpu.memory_space<vmem>>, vector<16x128xf32>
      %cst_12 = arith.constant 0.000000e+00 : f32
      %13 = vector.broadcast %cst_12 : f32 to vector<16x128xf32>
      %14 = arith.maximumf %12, %13 : vector<16x128xf32>
      %15 = arith.truncf %14 : vector<16x128xf32> to vector<16x128xbf16>
      %c0_13 = arith.constant 0 : index
      %c0_14 = arith.constant 0 : index
      %16 = vector.load %arg5[%c0_13, %c0_14] : memref<16x128xbf16, #tpu.memory_space<vmem>>, vector<16x128xbf16>
      tpu.vector_store %arg5[%c0_13, %c0_14], %15 {strides = array<i32>} : memref<16x128xbf16, #tpu.memory_space<vmem>>, vector<16x128xbf16>,
    } else {
    }
    return
  }
  func.func @transform_0(%arg0: i32, %arg1: i32) -> (i32, i32) {
    %c0_i32 = arith.constant 0 : i32
    return %arg0, %arg1 : i32, i32
  }
  func.func @transform_1(%arg0: i32, %arg1: i32) -> (i32, i32) {
    %c0_i32 = arith.constant 0 : i32
    %c0_i32_0 = arith.constant 0 : i32
    return %arg1, %c0_i32 : i32, i32
  }
  func.func @transform_2(%arg0: i32, %arg1: i32) -> (i32, i32) {
    %c0_i32 = arith.constant 0 : i32
    %c0_i32_0 = arith.constant 0 : i32
    %c0_i32_1 = arith.constant 0 : i32
    return %c0_i32, %c0_i32_0 : i32, i32
  }
  func.func @transform_3(%arg0: i32, %arg1: i32) -> (i32, i32) {
    %c0_i32 = arith.constant 0 : i32
    %c0_i32_0 = arith.constant 0 : i32
    return %arg0, %c0_i32 : i32, i32
  }
}

</mosaic_0001>

<bundles_post_ra>
// kernel: tpu_custom_call.1
= control target key start
LH: loop header
LB: loop body
LE: loop exit
PB: predicated region body
PF: predicated region fallthrough
CT: control target
= control target key end

     0   :  { %8 = vsyncpa [#allocation4], 0  ;;  %s474_s0 = inlined_call_operand.hbm [shape: bf16[16,128], index: 0, kind: input, shape index: {}]   ;;  %s475_s1 = inlined_call_operand.hbm [shape: bf16[128,128], index: 1, kind: input, shape index: {}]   ;;  %s476_s2 = inlined_call_operand.hbm [shape: f32[1,128], index: 2, kind: input, shape index: {}]   ;;  %s477_s3 = inlined_call_operand.hbm [shape: bf16[16,128], index: 3, kind: output, shape index: {}]  }
   0x1   :  { %9 = vsyncpa [#allocation7], 0 }
   0x2   :  { %10 = vsyncpa [#allocation5], 0  ;;  %s382_s12 = smov [#allocation6]   ;;  %s383_s14 = smov [#allocation3]  }
   0x3   :  { %s28_s13 = sshll.u32 %s382_s12, 4  ;;  %s16_s15 = sshll.u32 %s383_s14, 4  ;;  %s29_s13 = int_to_ptr.vmem [resolvable:$true] %s28_s13  ;;  %s410_s15 = int_to_ptr.vmem [resolvable:$true] %s16_s15 }
   0x4   :  { %s288_s18 = scalar_lea.hbm %s475_s1, 1024 }
   0x5   :  { %p289_p0 = scmp.ne.s32.totalorder %s475_s1, %s288_s18  ;;  %p292_p1 = scmp.lt.u32.totalorder %s288_s18, %s475_s1 }
   0x7   :  { %p294_p2 = pnand %p292_p1, %p289_p0 }
   0x9   :  { %297 = shalt.err (!%p294_p2)
}
   0xa   :  { %s298_s23 = scalar_lea.vmem %s29_s13, 1024  ;;  %p303_p4 = scmp.lt.s32.totalorder %s29_s13, %s29_s13 }
   0xb   :  { %p299_p3 = scmp.ne.s32.totalorder %s29_s13, %s298_s23  ;;  %p304_p5 = scmp.lt.s32.totalorder %s298_s23, %s298_s23 }
   0xd   :  { %p305_p6 = por %p304_p5, %p303_p4 }
   0xf   :  { %p306_p7 = pnand %p305_p6, %p299_p3 }
  0x11   :  { %309 = shalt.err (!%p306_p7)
}
  0x12   :  { %s384_s24 = smov 64   ;;  %s385_s25 = smov 4  }
  0x13   :  { %34 = dma.hbm_to_vmem [thread:$0]  %s475_s1, 1024, %s29_s13, [#allocation7], %s384_s24, %s384_s24, %s385_s25  }
  0x14   :  { %s310_s30 = scalar_lea.hbm %s474_s0, 128 }
  0x15   :  { %p311_p8 = scmp.ne.s32.totalorder %s474_s0, %s310_s30  ;;  %p314_p9 = scmp.lt.u32.totalorder %s310_s30, %s474_s0 }
  0x17   :  { %p316_p10 = pnand %p314_p9, %p311_p8 }
  0x19   :  { %319 = shalt.err (!%p316_p10)
}
  0x1a   :  { %s320_s8 = scalar_lea.vmem %s410_s15, 128  ;;  %p325_p12 = scmp.lt.s32.totalorder %s410_s15, %s410_s15 }
  0x1b   :  { %p321_p11 = scmp.ne.s32.totalorder %s410_s15, %s320_s8  ;;  %p326_p13 = scmp.lt.s32.totalorder %s320_s8, %s320_s8 }
  0x1d   :  { %p327_p0 = por %p326_p13, %p325_p12 }
  0x1f   :  { %p328_p1 = pnand %p327_p0, %p321_p11 }
  0x21   :  { %331 = shalt.err (!%p328_p1)
}
  0x22   :  { %22 = dma.hbm_to_vmem [thread:$0]  %s474_s0, 128, %s410_s15, [#allocation4], %s384_s24, %s384_s24, %s385_s25  }
  0x23   :  { %s386_s10 = smov [#allocation8]   ;;  %s332_s14 = scalar_lea.hbm %s476_s2, 16 }
  0x24   :  { %s41_s11 = sshll.u32 %s386_s10, 4  ;;  %p333_p2 = scmp.ne.s32.totalorder %s476_s2, %s332_s14  ;;  %s42_s11 = int_to_ptr.vmem [resolvable:$true] %s41_s11 }
  0x25   :  { %p336_p3 = scmp.lt.u32.totalorder %s332_s14, %s476_s2 }
  0x27   :  { %p338_p4 = pnand %p336_p3, %p333_p2 }
  0x29   :  { %341 = shalt.err (!%p338_p4)
}
  0x2a   :  { %s342_s20 = scalar_lea.vmem %s42_s11, 16  ;;  %s346_s0 = scalar_lea.vmem %s42_s11, 32 }
  0x2b   :  { %p343_p5 = scmp.ne.s32.totalorder %s42_s11, %s342_s20  ;;  %p347_p6 = scmp.lt.s32.totalorder %s42_s11, %s42_s11 }
  0x2c   :  { %p348_p7 = scmp.lt.s32.totalorder %s346_s0, %s342_s20 }
  0x2e   :  { %p349_p8 = por %p348_p7, %p347_p6 }
  0x30   :  { %p350_p9 = pnand %p349_p8, %p343_p5 }
  0x32   :  { %353 = shalt.err (!%p350_p9)
}
  0x33   :  { %44 = dma.hbm_to_vmem [thread:$0]  %s476_s2, 16, %s42_s11, [#allocation7]  }
  0x34   :  { %376 = dma.done.wait [#allocation4], 128  }
  0x35   :  { %377 = vsyncadd [#allocation4], 4294967168 }
  0x36   :  { %378 = dma.done.wait [#allocation7], 1040  }
  0x37   :  { %379 = vsyncadd [#allocation7], 4294966256  ;;  %v387_v0 = vmov 0.0   ;;  %vm388_vm0 = vmmov 0   ;;  %v279_v1 = vld [vmem:[#allocation6] sm:$0xff]   ;;  %v280_v2 = vld [vmem:[#allocation6 + $0x8] sm:$0xff]  }
  0x38   :  { %251 = vmatprep.subr.bf16.mxu0 %v387_v0  ;;  %267 = vmatprep.mubr.msk.bf16.mxu0 %vm388_vm0, %v387_v0  ;;  %v281_v3 = vld [vmem:[#allocation6 + $0x10] sm:$0xff]   ;;  %v282_v4 = vld [vmem:[#allocation6 + $0x18] sm:$0xff]   ;;  %v283_v5 = vld [vmem:[#allocation6 + $0x20] sm:$0xff]   ;;  %s389_s2 = smov [#allocation9]  }
  0x39   :  { %252 = vmatpush3.bf16.msra.mxu0 %v279_v1  ;;  %v284_v6 = vld [vmem:[#allocation6 + $0x28] sm:$0xff]   ;;  %v285_v7 = vld [vmem:[#allocation6 + $0x30] sm:$0xff]   ;;  %v286_v8 = vld [vmem:[#allocation6 + $0x38] sm:$0xff]   ;;  %s210_s22 = sshll.u32 %s389_s2, 4  ;;  %s211_s22 = int_to_ptr.vmem [resolvable:$true] %s210_s22 }
  0x3a   :  { %253 = vmatprep.subr.bf16.mxu0 %v387_v0  ;;  %v287_v9 = vld [vmem:[#allocation3] sm:$0xff]   ;;  %v223_v10 = vld [vmem:[#allocation8] ss:$0 sm:$0xff]  ;;  %s354_s23 = scalar_lea.vmem %s211_s22, 128  ;;  %p359_p11 = scmp.lt.s32.totalorder %s211_s22, %s211_s22 }
  0x3b   :  { %p355_p10 = scmp.ne.s32.totalorder %s211_s22, %s354_s23  ;;  %p360_p12 = scmp.lt.s32.totalorder %s354_s23, %s354_s23 }
  0x3d   :  { %254 = vmatpush3.bf16.msra.mxu0 %v280_v2  ;;  %p361_p13 = por %p360_p12, %p359_p11 }
  0x3e   :  { %255 = vmatprep.subr.bf16.mxu0 %v387_v0 }
  0x3f   :  { %p362_p0 = pnand %p361_p13, %p355_p10 }
  0x41   :  { %256 = vmatpush3.bf16.msra.mxu0 %v281_v3 }
  0x42   :  { %257 = vmatprep.subr.bf16.mxu0 %v387_v0 }
  0x45   :  { %258 = vmatpush3.bf16.msra.mxu0 %v282_v4 }
  0x46   :  { %259 = vmatprep.subr.bf16.mxu0 %v387_v0 }
  0x49   :  { %260 = vmatpush3.bf16.msra.mxu0 %v283_v5 }
  0x4a   :  { %261 = vmatprep.subr.bf16.mxu0 %v387_v0 }
  0x4d   :  { %262 = vmatpush3.bf16.msra.mxu0 %v284_v6 }
  0x4e   :  { %263 = vmatprep.subr.bf16.mxu0 %v387_v0 }
  0x51   :  { %264 = vmatpush3.bf16.msra.mxu0 %v285_v7 }
  0x52   :  { %265 = vmatprep.subr.bf16.mxu0 %v387_v0 }
  0x55   :  { %266 = vmatpush3.bf16.msra.mxu0 %v286_v8 }
  0x58   :  { %268 = vmatmul.mubr.bf16.vlgmr.msra.gmra.mrb[0].mxu0 %v287_v9 }
 0x12b   :  { %v177_v11 = vpop.f32.mrb[0].mxu0 }
 0x12c   :  { %v184_v12 = vadd.f32 %v223_v10, %v177_v11  ;;  %v269_v13 = vpop.f32.mrb[1].mxu0 }
 0x12d   :  { %v180_v14 = vpop.f32.mrb[2].mxu0 }
 0x12e   :  { %v185_v15 = vadd.f32 %v223_v10, %v180_v14  ;;  %v270_v16 = vpop.f32.mrb[3].mxu0  ;;  %v193_v17 = vmax.f32 %v184_v12, 0.0 }
 0x130   :  { %v194_v18 = vmax.f32 %v185_v15, 0.0 }
 0x132   :  { %v240_v19 = vpack.c.bf16 %v194_v18, %v193_v17 }
 0x134   :  { %241 = vst [vmem:[#allocation9] sm:$0xff] %v240_v19  }
 0x135   :  { %365 = shalt.err (!%p362_p0)
}
 0x136   :  { %s366_s28 = scalar_lea.hbm %s477_s3, 128 }
 0x137   :  { %p367_p1 = scmp.ne.s32.totalorder %s477_s3, %s366_s28  ;;  %p370_p2 = scmp.lt.u32.totalorder %s366_s28, %s477_s3 }
 0x139   :  { %p372_p3 = pnand %p370_p2, %p367_p1 }
 0x13b   :  { %375 = shalt.err (!%p372_p3)
}
 0x13c   :  { %216 = dma.vmem_to_hbm [thread:$0]  %s211_s22, 128, %s477_s3, [#allocation5], %s384_s24, %s384_s24, %s385_s25  }
 0x13d   :  { %380 = dma.done.wait [#allocation5], 128  }
 0x13e   :  { %381 = vsyncadd [#allocation5], 4294967168 }
 0x13f   :  { %220 = vsyncpa [#allocation4], 1 }
 0x140   :  { %221 = vsyncpa [#allocation7], 1 }
 0x141   :  { %222 = vsyncpa [#allocation5], 1 }

</bundles_post_ra>
